<compile_context>
chip_gen: v6e
topology: v6e:2x2x1
jax: 0.10.0
libtpu: 0.0.40
codegen_flags: <defaults>
</compile_context>

<pallas_src>
import jax
import jax.numpy as jnp
from jax.experimental import pallas as pl
from jax.experimental.pallas import tpu as pltpu


def _identity_kernel(x_ref, o_ref):
    # Entire forward pass: y = x (single unmasked VMEM tile copy).
    o_ref[...] = x_ref[...]


def sub_model_forward(x: jax.Array) -> jax.Array:
    """Pallas implementation of SubModel.forward: returns x unchanged.

    Fast path for production would be `return x`; the Pallas kernel is kept
    for fidelity with the "run a kernel" requirement but is reduced to one
    lane-dense VMEM tile copy with input/output buffer aliasing.
    """
    orig_shape = x.shape
    n = x.size

    # Lane-dense slab: last dim a multiple of 128 → unmasked full-width
    # stores and the fewest possible vreg tiles.  For (2,2,16,16) f32 this is
    # exactly one (8, 128) vreg.
    if n % 128 == 0:
        slab = x.reshape(n // 128, 128)
    else:
        slab = x.reshape(-1, orig_shape[-1])  # fallback (not hit here)

    out = pl.pallas_call(
        _identity_kernel,
        out_shape=jax.ShapeDtypeStruct(slab.shape, slab.dtype),
        # No grid: whole array lives in VMEM for the single invocation.
        in_specs=[pl.BlockSpec(memory_space=pltpu.MemorySpace.VMEM)],
        out_specs=pl.BlockSpec(memory_space=pltpu.MemorySpace.VMEM),
        # Reuse the input HBM buffer for the output (in-place pass-through
        # when the buffer is donatable; XLA copies defensively otherwise).
        input_output_aliases={0: 0},
    )(slab)

    return out.reshape(orig_shape)


def init_params():
    """Deterministic parameter init mirroring SubModel.__init__ shapes.
    (Unused by forward — kept only for shape fidelity with the PyTorch module.)"""
    return {
        # nn.Conv2d(2, 2, kernel_size=1, groups=2) -> weight (2, 1, 1, 1), bias (2,)
        "conv1_weight": jnp.full((2, 1, 1, 1), 0.5, dtype=jnp.float32),
        "conv1_bias": jnp.zeros((2,), dtype=jnp.float32),
        # nn.GroupNorm(2, 2) -> weight (2,), bias (2,)
        "gn_weight": jnp.ones((2,), dtype=jnp.float32),
        "gn_bias": jnp.zeros((2,), dtype=jnp.float32),
        # nn.Parameter(torch.ones(1))
        "param1": jnp.ones((1,), dtype=jnp.float32),
    }


if __name__ == "__main__":
    key = jax.random.PRNGKey(0)
    # B=2, C=2 (conv1 expects 2 input channels), H=W=16 -> 1024 elems = (8,128)
    x = jax.random.normal(key, (2, 2, 16, 16), dtype=jnp.float32)

    _ = init_params()  # parameters exist but forward ignores them (as in PyTorch)

    y = sub_model_forward(x)
    y = jax.block_until_ready(y)

    assert y.shape == x.shape and y.dtype == x.dtype
    assert bool(jnp.all(y == x))
    print("KERNEL_OK")
</pallas_src>

<mosaic_0001>
module attributes {stable_mosaic.version = 11 : i64} {
  func.func @_identity_kernel(%arg0: memref<8x128xf32, #tpu.memory_space<vmem>>, %arg1: memref<8x128xf32, #tpu.memory_space<vmem>>) attributes {dimension_semantics = [], scalar_prefetch = 0 : i64, scratch_operands = 0 : i64, tpu.core_type = #tpu.core_type<tc>} {
    %c0 = arith.constant 0 : index
    %c0_0 = arith.constant 0 : index
    %0 = vector.load %arg0[%c0, %c0_0] : memref<8x128xf32, #tpu.memory_space<vmem>>, vector<8x128xf32>
    %c0_1 = arith.constant 0 : index
    %c0_2 = arith.constant 0 : index
    %1 = vector.load %arg1[%c0_1, %c0_2] : memref<8x128xf32, #tpu.memory_space<vmem>>, vector<8x128xf32>
    tpu.vector_store %arg1[%c0_1, %c0_2], %0 {strides = array<i32>} : memref<8x128xf32, #tpu.memory_space<vmem>>, vector<8x128xf32>,
    return
  }
}

</mosaic_0001>

<bundles_post_ra>
// kernel: tpu_custom_call.1
= control target key start
LH: loop header
LB: loop body
LE: loop exit
PB: predicated region body
PF: predicated region fallthrough
CT: control target
= control target key end

     0   :  { %6 = vsyncpa [#allocation3], 0  ;;  %s102_s0 = inlined_call_operand.hbm [shape: f32[8,128], index: 0, kind: input, shape index: {}, may-alias: {0,1}]   ;;  %s103_s1 = inlined_call_operand.hbm [shape: f32[8,128], index: 1, kind: output, shape index: {}, may-alias: {0,1}]  }
   0x1   :  { %7 = vsyncpa [#allocation4], 0  ;;  %s84_s6 = smov [#allocation2]  }
   0x2   :  { %s14_s7 = sshll.u32 %s84_s6, 4  ;;  %s15_s7 = int_to_ptr.vmem [resolvable:$true] %s14_s7 }
   0x3   :  { %s48_s8 = scalar_lea.vmem %s15_s7, 128  ;;  %p53_p1 = scmp.lt.s32.totalorder %s15_s7, %s15_s7 }
   0x4   :  { %p49_p0 = scmp.ne.s32.totalorder %s15_s7, %s48_s8  ;;  %p54_p2 = scmp.lt.s32.totalorder %s48_s8, %s48_s8 }
   0x6   :  { %p55_p3 = por %p54_p2, %p53_p1 }
   0x8   :  { %p56_p4 = pnand %p55_p3, %p49_p0 }
   0xa   :  { %59 = shalt.err (!%p56_p4)
}
   0xb   :  { %17 = dma.hbm_to_vmem [thread:$0]  %s102_s0, 128, %s15_s7, [#allocation3]  }
   0xc   :  { %80 = dma.done.wait [#allocation3], 128  }
   0xd   :  { %81 = vsyncadd [#allocation3], 4294967168  ;;  %s85_s11 = smov [#allocation5]   ;;  %v21_v0 = vld [vmem:[#allocation2] sm:$0xff] }
   0xe   :  { %s29_s12 = sshll.u32 %s85_s11, 4  ;;  %22 = vst [vmem:[#allocation5] sm:$0xff] %v21_v0  ;;  %s30_s12 = int_to_ptr.vmem [resolvable:$true] %s29_s12 }
   0xf   :  { %s60_s13 = scalar_lea.vmem %s30_s12, 128  ;;  %p65_p6 = scmp.lt.s32.totalorder %s30_s12, %s30_s12 }
  0x10   :  { %p61_p5 = scmp.ne.s32.totalorder %s30_s12, %s60_s13  ;;  %p66_p7 = scmp.lt.s32.totalorder %s60_s13, %s60_s13 }
  0x12   :  { %p67_p8 = por %p66_p7, %p65_p6 }
  0x14   :  { %p68_p9 = pnand %p67_p8, %p61_p5 }
  0x16   :  { %71 = shalt.err (!%p68_p9)
}
  0x17   :  { %32 = dma.vmem_to_hbm [thread:$0]  %s30_s12, 128, %s103_s1, [#allocation4]  }
  0x18   :  { %82 = dma.done.wait [#allocation4], 128  }
  0x19   :  { %83 = vsyncadd [#allocation4], 4294967168 }
  0x1a   :  { %36 = vsyncpa [#allocation3], 1 }
  0x1b   :  { %37 = vsyncpa [#allocation4], 1 }

</bundles_post_ra>
